<compile_context>
chip_gen: v5e
topology: v5e:2x2
jax: 0.10.0
libtpu: 0.0.40
codegen_flags: <defaults>
</compile_context>

<pallas_src>
import functools

import numpy as np
import jax
import jax.numpy as jnp
from jax import lax
from jax.experimental import pallas as pl
from jax.experimental.pallas import tpu as pltpu

LEAKY_SLOPE = 0.2
CPAD = 8          # every activation carries 8 zero-padded channel rows / image
FLOW_DIM = 2
N_CONV = 12

# forward-order conv list: enc0..enc3, dec0..dec5, vm2, flow
KSIZE       = (4, 4, 4, 4, 3, 3, 3, 3, 3, 3, 3, 3)
STRIDE      = (2, 2, 2, 2, 1, 1, 1, 1, 1, 1, 1, 1)
IN_LEVEL    = (0, 1, 2, 3, 4, 3, 2, 1, 1, 0, 0, 0)   # input resolution level
PART_COUNTS = (1, 1, 1, 1, 1, 2, 2, 2, 1, 2, 1, 1)   # input parts (skip cats)


def _compute_w_layout():
    base, cur = [], 0
    for ci in range(N_CONV):
        base.append(cur)
        cur += KSIZE[ci] * KSIZE[ci] * PART_COUNTS[ci]
    return tuple(base), cur


_W_BASE, _N_WBLOCKS = _compute_w_layout()


def _part_channels(enc_nf, dec_nf):
    # actual #channels of each input part of each conv (cat order of forward)
    return ((2,), (enc_nf[0],), (enc_nf[1],), (enc_nf[2],), (enc_nf[3],),
            (dec_nf[0], enc_nf[2]), (dec_nf[1], enc_nf[1]),
            (dec_nf[2], enc_nf[0]), (dec_nf[3],), (dec_nf[4], 2),
            (dec_nf[5],), (dec_nf[6],))


def _tap_live(s, g, si, sj, h0, w0):
    """True iff tap (si, sj) contributes to at least one on-grid output."""
    ok_r = any(0 <= r + s * si < h0 for r in range(0, h0, g))
    ok_c = any(0 <= c + s * sj < w0 for c in range(0, w0, g))
    return ok_r and ok_c


# ---------------------------------------------------------------------------
# Probe the rotate direction of pltpu.roll once (makes the static shift
# amounts in the main kernel convention-independent).
# ---------------------------------------------------------------------------
@functools.lru_cache(maxsize=None)
def _roll_matches_jnp():
    def probe(x_ref, o_ref):
        o_ref[...] = pltpu.roll(x_ref[...], 1, axis=1)

    base = np.arange(128, dtype=np.float32)
    x = jnp.broadcast_to(jnp.asarray(base), (8, 128))
    y = pl.pallas_call(
        probe, out_shape=jax.ShapeDtypeStruct((8, 128), jnp.float32))(x)
    y0 = np.asarray(y)[0]
    if np.array_equal(y0, np.roll(base, 1)):
        return True
    if np.array_equal(y0, np.roll(base, -1)):
        return False
    raise RuntimeError("pltpu.roll produced an unexpected rotation")


# ---------------------------------------------------------------------------
# The fused Pallas kernel (whole forward pass, whole batch, one invocation)
# ---------------------------------------------------------------------------
def _unet_kernel(x_ref, w_ref, b_ref, o_ref, *, n_imgs, h0, w0,
                 roll_like_jnp):
    """x_ref : [n*CPAD, H*W]        f32  stacked (src,tgt) channel rows
       w_ref : [NBLK*n*CPAD, n*CPAD] bf16 per-(conv,part,tap) block-diag mixes
       b_ref : [N_CONV*n*CPAD, 1]   f32  per-conv stacked biases
       o_ref : [n, CPAD, H*W]       f32  flow in rows 0..1 of each image"""
    bf = jnp.bfloat16
    R = n_imgs * CPAD
    M = h0 * w0
    lw = w0.bit_length() - 1

    lane = lax.broadcasted_iota(jnp.int32, (R, M), 1)
    col = jnp.bitwise_and(lane, w0 - 1)
    row = jnp.right_shift(lane, lw)

    def shifted_read(a, delta):
        """out[:, m] = a[:, (m + delta) % M] (circular; masked by callers)."""
        if delta % M == 0:
            return a
        amt = (-delta) % M if roll_like_jnp else delta % M
        return pltpu.roll(a, amt, axis=1)

    def load_w(block):
        r0 = block * R
        return w_ref[r0:r0 + R, :]                     # [R, R] bf16

    def conv(ci, parts, act=True):
        """Conv (kernel k, stride 1 or 2, pad 1) + bias (+LeakyReLU) on the
        dilated flat-lane layout.  Per tap: roll (XLU) + mask (VPU) + tiny
        block-diag channel-mix matmul (MXU) accumulated in f32."""
        k = KSIZE[ci]
        s = 1 << IN_LEVEL[ci]
        g = s * STRIDE[ci]
        kk = k * k
        base = _W_BASE[ci]

        row_grid = jnp.bitwise_and(row, g - 1) == 0
        col_grid = jnp.bitwise_and(col, g - 1) == 0
        row_ok, col_ok = {}, {}
        for dd in range(k):
            sd = dd - 1
            rr = row + s * sd
            cc = col + s * sd
            row_ok[sd] = row_grid & (rr >= 0) & (rr < h0)
            col_ok[sd] = col_grid & (cc >= 0) & (cc < w0)

        acc = None
        for p, a in enumerate(parts):                  # a: [R, M] bf16
            for di in range(k):
                for dj in range(k):
                    si, sj = di - 1, dj - 1
                    if not _tap_live(s, g, si, sj, h0, w0):
                        continue                       # statically dead tap
                    delta = s * (si * w0 + sj)
                    shifted = shifted_read(a, delta)
                    valid = row_ok[si] & col_ok[sj]
                    tap = jnp.where(valid, shifted, jnp.zeros_like(shifted))
                    wblk = load_w(base + p * kk + di * k + dj)
                    contrib = jnp.dot(wblk, tap,
                                      preferred_element_type=jnp.float32)
                    acc = contrib if acc is None else acc + contrib

        acc = acc + b_ref[ci * R:(ci + 1) * R, :]      # f32 epilogue
        if act:
            acc = jnp.where(acc >= 0.0, acc, LEAKY_SLOPE * acc)
        return acc                                     # f32 [R, M]

    def up2x(a, out_level):
        """Nearest-neighbour 2x upsample = 4 rolls with parity masks."""
        s = 1 << out_level
        g = 2 * s
        row_sel = {e: jnp.bitwise_and(row, g - 1) == e * s for e in (0, 1)}
        col_sel = {f: jnp.bitwise_and(col, g - 1) == f * s for f in (0, 1)}
        out = None
        for e in (0, 1):
            for f in (0, 1):
                delta = s * (e * w0 + f)
                shifted = shifted_read(a, -delta)
                sel = row_sel[e] & col_sel[f]
                v = jnp.where(sel, shifted, jnp.zeros_like(shifted))
                out = v if out is None else out + v
        return out                                     # bf16 [R, M]

    x = x_ref[...].astype(bf)                          # [R, M]

    # ---- encoder: 4 x (k=4, stride 2, pad 1) + LeakyReLU(0.2) --------------
    e0 = conv(0, [x]).astype(bf)
    e1 = conv(1, [e0]).astype(bf)
    e2 = conv(2, [e1]).astype(bf)
    e3 = conv(3, [e2]).astype(bf)

    # ---- decoder (k=3, stride 1, pad 1) + nearest-2x upsample + skips ------
    y = conv(4, [e3]).astype(bf)                       # dec0
    y = up2x(y, 3)
    y = conv(5, [y, e2]).astype(bf)                    # dec1 (skip = e2)
    y = up2x(y, 2)
    y = conv(6, [y, e1]).astype(bf)                    # dec2 (skip = e1)
    y = up2x(y, 1)
    y = conv(7, [y, e0]).astype(bf)                    # dec3 (skip = e0)
    y = conv(8, [y]).astype(bf)                        # dec4
    y = up2x(y, 0)                                     # full_size upsample
    y = conv(9, [y, x]).astype(bf)                     # dec5 (skip = input x)
    y = conv(10, [y]).astype(bf)                       # vm2_conv
    flow = conv(11, [y], act=False)                    # flow conv, no act
    # TODO(synk): U_Network's trailing BatchNorm2d only runs when bn is
    # truthy; this kernel implements the bn=None configuration and skips it.

    for b in range(n_imgs):                            # lane-dense full-tile store
        o_ref[b, :, :] = flow[b * CPAD:(b + 1) * CPAD, :]


# ---------------------------------------------------------------------------
# Parameter construction (deterministic, synthetic; shapes follow __init__)
# ---------------------------------------------------------------------------
def _init_conv(key, kh, kw, cin, cout):
    fan_in = kh * kw * cin
    scale = 1.0 / jnp.sqrt(jnp.float32(fan_in))
    w = scale * jax.random.normal(key, (kh, kw, cin, cout), jnp.float32)
    b = jnp.zeros((cout,), jnp.float32)
    return {"w": w, "b": b}


def init_unet_params(key, enc_nf, dec_nf, full_size=True, dim=2):
    vm2 = len(dec_nf) == 7
    keys = jax.random.split(key, 4 + len(enc_nf) + len(dec_nf))
    ki = 0
    params = {"enc": [], "dec": []}

    prev = 2
    for nf in enc_nf:                                  # k=4, stride 2, pad 1
        params["enc"].append(_init_conv(keys[ki], 4, 4, prev, nf)); ki += 1
        prev = nf

    dec_in = [enc_nf[-1], dec_nf[0] * 2, dec_nf[1] * 2,
              dec_nf[2] + enc_nf[0], dec_nf[3]]
    for i in range(5):                                 # k=3, stride 1, pad 1
        params["dec"].append(_init_conv(keys[ki], 3, 3, dec_in[i], dec_nf[i])); ki += 1
    if full_size:
        params["dec"].append(_init_conv(keys[ki], 3, 3, dec_nf[4] + 2, dec_nf[5])); ki += 1
    if vm2:
        params["vm2"] = _init_conv(keys[ki], 3, 3, dec_nf[5], dec_nf[6]); ki += 1

    # flow conv: weight ~ Normal(0, 1e-5), bias = 0 (as in the PyTorch module)
    flow_w = 1e-5 * jax.random.normal(keys[ki], (3, 3, dec_nf[-1], dim), jnp.float32)
    params["flow"] = {"w": flow_w, "b": jnp.zeros((dim,), jnp.float32)}
    return params


def pack_params(params, enc_nf, dec_nf, batch):
    """One-time weight packing into two consolidated slabs.

    NOTE: params here store conv weights as [KH, KW, Cin, Cout] (HWIO).  Real
    PyTorch Conv2d weights are [Cout, Cin, KH, KW] and must be permuted with
    w.permute(2, 3, 1, 0) before packing."""
    if len(enc_nf) != 4 or len(dec_nf) != 7:
        # TODO(synk): only the dim=2, vm2 (len(dec_nf)==7), full_size=True,
        # bn=None U_Network configuration is wired into the fused kernel.
        raise NotImplementedError("fused kernel expects 4 encoder / 7 decoder stages")
    if max(list(enc_nf) + list(dec_nf)) > CPAD:
        raise NotImplementedError("channel counts > 8 need a larger CPAD")

    convs = list(params["enc"]) + list(params["dec"]) + [params["vm2"], params["flow"]]
    parts_actual = _part_channels(enc_nf, dec_nf)
    R = batch * CPAD
    w_slab = np.zeros((_N_WBLOCKS * R, R), np.float32)
    b_slab = np.zeros((N_CONV * R, 1), np.float32)
    eye = np.eye(batch, dtype=np.float32)

    for ci, p in enumerate(convs):
        w = np.asarray(p["w"], np.float32)             # [KH, KW, Cin, Cout]
        kh, kw, cin, cout = w.shape
        assert kh == KSIZE[ci] and kw == KSIZE[ci]
        assert cin == sum(parts_actual[ci])
        coff = 0
        for pi, cp in enumerate(parts_actual[ci]):
            for di in range(kh):
                for dj in range(kw):
                    blk = np.zeros((CPAD, CPAD), np.float32)
                    blk[:cout, :cp] = w[di, dj, coff:coff + cp, :cout].T
                    bi = _W_BASE[ci] + pi * kh * kw + di * kw + dj
                    w_slab[bi * R:(bi + 1) * R, :] = np.kron(eye, blk)
            coff += cp
        bias = np.asarray(p["b"], np.float32)
        for bimg in range(batch):
            r0 = ci * R + bimg * CPAD
            b_slab[r0:r0 + cout, 0] = bias

    return {"w": jnp.asarray(w_slab, jnp.bfloat16),
            "b": jnp.asarray(b_slab, jnp.float32)}


# ---------------------------------------------------------------------------
# Fused forward pass (matches U_Network.forward; dim=2, bn=None, full_size)
# ---------------------------------------------------------------------------
@functools.partial(jax.jit, static_argnums=(3,))
def _forward_jit(packed, src, tgt, roll_like_jnp):
    n, cin, h, w = src.shape
    assert cin == 1 and tgt.shape == src.shape
    assert h % 16 == 0 and w % 16 == 0, "need 4 stride-2 halvings"
    assert (h & (h - 1)) == 0 and (w & (w - 1)) == 0, "power-of-two sizes"
    M0 = h * w
    R = n * CPAD
    assert packed["w"].shape == (_N_WBLOCKS * R, R), "pack_params batch mismatch"

    # boundary glue: NCHW src/tgt -> stacked [n*CPAD, H*W] channel rows
    x = jnp.concatenate([src, tgt], axis=1).reshape(n, 2, M0)
    xs = jnp.zeros((n, CPAD, M0), jnp.float32).at[:, :2, :].set(x)
    xs = xs.reshape(R, M0)

    kernel = functools.partial(
        _unet_kernel, n_imgs=n, h0=h, w0=w, roll_like_jnp=roll_like_jnp)

    vmem_spec = pl.BlockSpec(memory_space=pltpu.MemorySpace.VMEM)
    out = pl.pallas_call(
        kernel,
        out_shape=jax.ShapeDtypeStruct((n, CPAD, M0), jnp.float32),
        in_specs=[vmem_spec, vmem_spec, vmem_spec],
        out_specs=vmem_spec,
    )(xs, packed["w"], packed["b"])

    return out[:, :FLOW_DIM, :].reshape(n, FLOW_DIM, h, w)   # NCHW flow field


def u_network_forward(packed, src, tgt):
    return _forward_jit(packed, src, tgt, _roll_matches_jnp())


# ---------------------------------------------------------------------------
# Pure-XLA reference (for a runtime numerical check)
# ---------------------------------------------------------------------------
def _conv_ref(x, w, b, stride, pad, act):
    out = lax.conv_general_dilated(
        x, w, window_strides=(stride, stride),
        padding=((pad, pad), (pad, pad)),
        dimension_numbers=("NCHW", "HWIO", "NCHW"))
    out = out + b.reshape(1, -1, 1, 1)
    if act:
        out = jnp.where(out >= 0.0, out, LEAKY_SLOPE * out)
    return out


def u_network_reference(params, src, tgt):
    up = lambda t: jnp.repeat(jnp.repeat(t, 2, axis=2), 2, axis=3)
    x = jnp.concatenate([src, tgt], axis=1)
    x_enc = [x]
    for p in params["enc"]:
        x_enc.append(_conv_ref(x_enc[-1], p["w"], p["b"], 2, 1, True))
    y = x_enc[-1]
    for i in range(3):
        p = params["dec"][i]
        y = _conv_ref(y, p["w"], p["b"], 1, 1, True)
        y = up(y)
        y = jnp.concatenate([y, x_enc[-(i + 2)]], axis=1)
    y = _conv_ref(y, params["dec"][3]["w"], params["dec"][3]["b"], 1, 1, True)
    y = _conv_ref(y, params["dec"][4]["w"], params["dec"][4]["b"], 1, 1, True)
    y = up(y)
    y = jnp.concatenate([y, x_enc[0]], axis=1)
    y = _conv_ref(y, params["dec"][5]["w"], params["dec"][5]["b"], 1, 1, True)
    y = _conv_ref(y, params["vm2"]["w"], params["vm2"]["b"], 1, 1, True)
    return _conv_ref(y, params["flow"]["w"], params["flow"]["b"], 1, 1, False)


# ---------------------------------------------------------------------------
if __name__ == "__main__":
    key = jax.random.PRNGKey(0)
    pkey, skey, tkey = jax.random.split(key, 3)

    # dim=2, vm2 decoder (7 entries), bn=None, full_size=True
    enc_nf = [4, 8, 8, 8]
    dec_nf = [8, 8, 8, 8, 8, 4, 4]

    params = init_unet_params(pkey, enc_nf, dec_nf, full_size=True, dim=2)
    packed = pack_params(params, enc_nf, dec_nf, batch=2)  # once, off hot path

    src = jax.random.normal(skey, (2, 1, 16, 16), jnp.float32)
    tgt = jax.random.normal(tkey, (2, 1, 16, 16), jnp.float32)

    flow = u_network_forward(packed, src, tgt)
    flow = jax.block_until_ready(flow)

    assert flow.shape == (2, 2, 16, 16), flow.shape
    assert bool(jnp.all(jnp.isfinite(flow)))

    # numerical check vs. a pure-XLA f32 reference (kernel uses bf16 operands)
    ref = jax.block_until_ready(jax.jit(u_network_reference)(params, src, tgt))
    err = float(jnp.max(jnp.abs(flow - ref)))
    scale = float(jnp.max(jnp.abs(ref))) + 1e-12
    assert err <= 0.08 * scale + 1e-6, (err, scale)

    print("KERNEL_OK")
</pallas_src>

<mosaic_0001>
module attributes {stable_mosaic.version = 11 : i64} {
  func.func @probe(%arg0: memref<8x128xf32, #tpu.memory_space<vmem>>, %arg1: memref<8x128xf32, #tpu.memory_space<vmem>>) attributes {dimension_semantics = [], scalar_prefetch = 0 : i64, scratch_operands = 0 : i64, tpu.core_type = #tpu.core_type<tc>} {
    %c0 = arith.constant 0 : index
    %c0_0 = arith.constant 0 : index
    %0 = vector.load %arg0[%c0, %c0_0] : memref<8x128xf32, #tpu.memory_space<vmem>>, vector<8x128xf32>
    %c1_i32 = arith.constant 1 : i32
    %1 = tpu.dynamic_rotate %0 by %c1_i32 dim 1 : vector<8x128xf32>, i32 -> vector<8x128xf32>
    %c0_1 = arith.constant 0 : index
    %c0_2 = arith.constant 0 : index
    %2 = vector.load %arg1[%c0_1, %c0_2] : memref<8x128xf32, #tpu.memory_space<vmem>>, vector<8x128xf32>
    tpu.vector_store %arg1[%c0_1, %c0_2], %1 {strides = array<i32>} : memref<8x128xf32, #tpu.memory_space<vmem>>, vector<8x128xf32>,
    return
  }
}

</mosaic_0001>

<bundles_post_ra>
// kernel: tpu_custom_call.1
= control target key start
LH: loop header
LB: loop body
LE: loop exit
PB: predicated region body
PF: predicated region fallthrough
CT: control target
= control target key end

     0   :  { %6 = vsyncpa [#allocation3], 0  ;;  %s118_s0 = inlined_call_operand.hbm [shape: f32[8,128], index: 0, kind: input, shape index: {}]   ;;  %s119_s1 = inlined_call_operand.hbm [shape: f32[8,128], index: 1, kind: output, shape index: {}]  }
   0x1   :  { %7 = vsyncpa [#allocation4], 0  ;;  %s13_s8 = sshll.u32 %s118_s0, 4  ;;  %s99_s9 = smov [#allocation2]   ;;  %s14_s8 = int_to_ptr.hbm [resolvable:$true] %s13_s8 }
   0x2   :  { %s15_s10 = sshll.u32 %s99_s9, 4  ;;  %s16_s10 = int_to_ptr.vmem [resolvable:$true] %s15_s10 }
   0x3   :  { %18 = dma.hbm_to_vmem [thread:$0]  %s14_s8, 128, %s16_s10, [#allocation3]  }
   0x4   :  { %95 = dma.done.wait [#allocation3], 128  }
   0x5   :  { %96 = vsyncadd [#allocation3], 4294967168  ;;  %v23_v0 = vld [vmem:[#allocation2] sm:$0xff]  ;;  %s100_s11 = smov 1   ;;  %s101_s12 = smov [#allocation5]  }
   0x6   :  { %24 = vrot.lane.b32.xlu0 %v23_v0, %s100_s11  ;;  %s32_s13 = sshll.u32 %s101_s12, 4  ;;  %s34_s16 = sshll.u32 %s119_s1, 4  ;;  %s33_s13 = int_to_ptr.vmem [resolvable:$true] %s32_s13  ;;  %s35_s16 = int_to_ptr.hbm [resolvable:$true] %s34_s16 }
  0x78   :  { %v25_v1 = vpop.permute.xlu0 %24 }
  0x79   :  { %26 = vst [vmem:[#allocation5] sm:$0xff] %v25_v1 }
  0x7a   :  { %37 = dma.vmem_to_hbm [thread:$0]  %s33_s13, 128, %s35_s16, [#allocation4]  }
  0x7b   :  { %97 = dma.done.wait [#allocation4], 128  }
  0x7c   :  { %98 = vsyncadd [#allocation4], 4294967168 }
  0x7d   :  { %42 = vsyncpa [#allocation3], 1 }
  0x7e   :  { %43 = vsyncpa [#allocation4], 1 }

</bundles_post_ra>
